<compile_context>
chip_gen: v7x
topology: tpu7x:2x2x1
jax: 0.10.0
libtpu: 0.0.40
codegen_flags: <defaults>
</compile_context>

<pallas_src>
import math

import jax
import jax.numpy as jnp
from jax.experimental import pallas as pl
from jax.experimental.pallas import tpu as pltpu


def make_mha_kernel(h: int, d_k: int):
    def mha_kernel(q_ref, kproj_ref, wqT_ref, bq_ref, bias_ref, out_ref):
        # q_ref:     (1, tq, D)   bf16 raw query tile
        # kproj_ref: (1, L, D)    bf16 key projection (precomputed per batch)
        # wqT_ref:   (D, D)       bf16 W_q^T with 1/sqrt(d_k) folded in
        # bq_ref:    (1, D)       f32 scaled b_q
        # bias_ref:  (1, 1, L)    f32 additive mask bias (0 / -1e9)
        # out_ref:   (1, h, tq, L) attention probabilities (bf16 by default)

        # Query projection for this tile (bf16 MXU inputs, f32 accumulate).
        qp = jnp.dot(q_ref[0], wqT_ref[...],
                     preferred_element_type=jnp.float32) + bq_ref[...]
        q_bf = qp.astype(jnp.bfloat16)                      # (tq, D)
        k_bf = kproj_ref[0]                                 # (L, D)
        bias = bias_ref[0]                                  # (1, L)

        # Per-head QK^T: contract the last dims of both operands (== q @ k^T
        # without materializing a transpose).  Softmax + store per head so at
        # most one (tq, L) f32 temporary is live at a time; every (tq, L)
        # store is lane-dense.
        # TODO(synk): if profiling shows the MXU (not HBM writeback) binds,
        # pad each head to 128 lanes / batch the dot_general instead of using
        # sub-128 lane slices.
        dn = (((1,), (1,)), ((), ()))
        for i in range(h):
            s = jax.lax.dot_general(q_bf[:, i * d_k:(i + 1) * d_k],
                                    k_bf[:, i * d_k:(i + 1) * d_k],
                                    dn, preferred_element_type=jnp.float32)
            s = s + bias                                    # broadcast (1, L)
            s = s - jnp.max(s, axis=-1, keepdims=True)      # stable softmax
            e = jnp.exp(s)
            inv = pl.reciprocal(jnp.sum(e, axis=-1, keepdims=True), approx=True)
            out_ref[0, i] = (e * inv).astype(out_ref.dtype)

    return mha_kernel


def multi_head_attention(query, key, mask, wq, bq, wk, bk, h, *,
                         tq=None, out_dtype=jnp.bfloat16):
    """query, key: (B, L, D); mask: (B, 1, L_full); nn.Linear params wq/bq, wk/bk.

    Returns attention probabilities of shape (B, h, L, L) in `out_dtype`
    (bfloat16 by default — halves the O(B*h*L^2) HBM writeback).
    """
    B, Lq, D = query.shape
    Bk, Lk, Dk = key.shape
    assert D % h == 0 and D == Dk and B == Bk
    # The PyTorch module slices the mask to the *query* length but applies it
    # along the *key* axis; that is only consistent when L_q == L_k.
    assert Lq == Lk, "MultiHeadAttention (DualGCN) assumes L_q == L_k"
    L = Lq
    d_k = D // h
    scale = 1.0 / math.sqrt(d_k)

    # Query-row tiling (keeps the (1, h, tq, L) output block small on v7x).
    if tq is None:
        tq = 128 if (L >= 128 and L % 128 == 0) else L
    assert L % tq == 0
    nq = L // tq

    # --- one-time HBM-side prep -------------------------------------------
    # nn.Linear weights -> (in, out); fold 1/sqrt(d_k) into the Q projection.
    wqT = (wq.T * scale).astype(jnp.bfloat16)
    bq2 = (bq * scale).reshape(1, D).astype(jnp.float32)
    # Key projection precomputed with the same precision as the in-kernel path
    # (bf16 inputs, f32 accumulate).  Removes the qi-carried scratch so both
    # grid axes can be "parallel" (v7x megacore) and halves per-tile input DMA.
    k_proj = (jnp.dot(key.astype(jnp.bfloat16), wk.T.astype(jnp.bfloat16),
                      preferred_element_type=jnp.float32)
              + bk.astype(jnp.float32)).astype(jnp.bfloat16)
    # Additive mask bias precomputed (matches `mask[:, :, :query.size(1)]`).
    bias = jnp.where(mask[:, :, :L] == 0, jnp.float32(-1e9),
                     jnp.float32(0.0)).astype(jnp.float32)
    q_bf = query.astype(jnp.bfloat16)

    # Explicit scoped-VMEM budget: double-buffered blocks + f32 softmax temps,
    # ~30% headroom, clamped to the v7x 64 MiB physical VMEM.
    out_bytes = jnp.dtype(out_dtype).itemsize
    vmem_est = (2 * tq * D * 2                 # query tile (bf16)
                + 2 * L * D * 2                # key-projection block (bf16)
                + 2 * D * D * 2                # W_q^T (bf16)
                + 2 * D * 4                    # b_q
                + 2 * L * 4                    # mask bias
                + 2 * h * tq * L * out_bytes   # output block
                + 4 * tq * L * 4)              # per-head f32 temporaries
    vmem_limit = int(min(max(int(vmem_est * 1.3), 16 * 1024 * 1024),
                         64 * 1024 * 1024))

    kernel = make_mha_kernel(h, d_k)

    # TODO(synk): callers that only need attn @ V should use a fused attn@V
    # variant to avoid the O(B*h*L^2) HBM writeback entirely.
    out = pl.pallas_call(
        kernel,
        out_shape=jax.ShapeDtypeStruct((B, h, L, L), out_dtype),
        grid_spec=pltpu.PrefetchScalarGridSpec(
            num_scalar_prefetch=0,
            grid=(B, nq),
            in_specs=[
                pl.BlockSpec((1, tq, D), lambda b, qi: (b, qi, 0)),   # query tile (bf16)
                pl.BlockSpec((1, L, D), lambda b, qi: (b, 0, 0)),     # K proj (bf16)
                pl.BlockSpec((D, D), lambda b, qi: (0, 0)),           # W_q^T (bf16, scaled)
                pl.BlockSpec((1, D), lambda b, qi: (0, 0)),           # b_q (scaled)
                pl.BlockSpec((1, 1, L), lambda b, qi: (b, 0, 0)),     # mask bias
            ],
            out_specs=pl.BlockSpec((1, h, tq, L), lambda b, qi: (b, 0, qi, 0)),
        ),
        compiler_params=pltpu.CompilerParams(
            dimension_semantics=("parallel", "parallel"),
            vmem_limit_bytes=vmem_limit),
    )(q_bf, k_proj, wqT, bq2, bias)
    return out


def reference_mha(query, key, mask, wq, bq, wk, bk, h):
    """Pure-JAX reference mirroring the PyTorch module (eval mode)."""
    B, L, D = query.shape
    d_k = D // h
    mask = mask[:, :, :L]
    mask = mask[:, None, :, :]                     # (B, 1, 1, L)
    q = query @ wq.T + bq
    k = key @ wk.T + bk
    q = q.reshape(B, L, h, d_k).transpose(0, 2, 1, 3)
    k = k.reshape(B, L, h, d_k).transpose(0, 2, 1, 3)
    scores = (q @ k.transpose(0, 1, 3, 2)) / math.sqrt(d_k)
    scores = jnp.where(mask == 0, -1e9, scores)
    return jax.nn.softmax(scores, axis=-1)
    # TODO(synk): nn.Dropout(p=0.1) on attn is identity in eval mode; training-time
    # stochastic dropout is intentionally not reproduced.


if __name__ == "__main__":
    B, L_full, L, D, h = 2, 10, 8, 32, 4

    key0 = jax.random.PRNGKey(0)
    k1, k2, k3, k4, k5, k6, k7 = jax.random.split(key0, 7)

    query = jax.random.normal(k1, (B, L, D), dtype=jnp.float32)
    keyx = jax.random.normal(k2, (B, L, D), dtype=jnp.float32)
    mask = (jax.random.uniform(k3, (B, 1, L_full)) > 0.3).astype(jnp.float32)

    # Deterministic nn.Linear-style parameters (W: (out, in), b: (out,))
    bound = 1.0 / math.sqrt(D)
    wq = jax.random.uniform(k4, (D, D), minval=-bound, maxval=bound, dtype=jnp.float32)
    bq = jax.random.uniform(k5, (D,), minval=-bound, maxval=bound, dtype=jnp.float32)
    wk = jax.random.uniform(k6, (D, D), minval=-bound, maxval=bound, dtype=jnp.float32)
    bk = jax.random.uniform(k7, (D,), minval=-bound, maxval=bound, dtype=jnp.float32)

    attn = multi_head_attention(query, keyx, mask, wq, bq, wk, bk, h)
    attn = jax.block_until_ready(attn)

    ref = reference_mha(query, keyx, mask, wq, bq, wk, bk, h)
    assert attn.shape == (B, h, L, L)
    assert attn.dtype == jnp.bfloat16
    # bf16 MXU inputs + bf16 output + approx reciprocal loosen the tolerance
    # vs. the f32 reference.
    assert jnp.allclose(attn.astype(jnp.float32), ref, atol=2e-2, rtol=2e-2), \
        "mismatch vs reference"

    print("KERNEL_OK")
</pallas_src>

<mosaic_0001>
module attributes {stable_mosaic.version = 11 : i64} {
  func.func @mha_kernel(%arg0: i32, %arg1: i32, %arg2: memref<1x8x32xbf16, #tpu.memory_space<vmem>>, %arg3: memref<1x8x32xbf16, #tpu.memory_space<vmem>>, %arg4: memref<32x32xbf16, #tpu.memory_space<vmem>>, %arg5: memref<1x32xf32, #tpu.memory_space<vmem>>, %arg6: memref<1x1x8xf32, #tpu.memory_space<vmem>>, %arg7: memref<1x4x8x8xbf16, #tpu.memory_space<vmem>>) attributes {dimension_semantics = [#tpu.dimension_semantics<parallel>, #tpu.dimension_semantics<parallel>], iteration_bounds = array<i64: 2, 1>, scalar_prefetch = 0 : i64, scratch_operands = 0 : i64, tpu.core_type = #tpu.core_type<tc>, window_params = [{transform_indices = @transform_0, window_bounds = array<i64: 1, 8, 32>}, {transform_indices = @transform_1, window_bounds = array<i64: 1, 8, 32>}, {pipeline_mode = #tpu.pipeline_mode<synchronous>, transform_indices = @transform_2, window_bounds = array<i64: 32, 32>}, {pipeline_mode = #tpu.pipeline_mode<synchronous>, transform_indices = @transform_3, window_bounds = array<i64: 1, 32>}, {transform_indices = @transform_4, window_bounds = array<i64: 1, 1, 8>}, {transform_indices = @transform_5, window_bounds = array<i64: 1, 4, 8, 8>}]} {
    %c0 = arith.constant 0 : index
    %c0_0 = arith.constant 0 : index
    %c0_1 = arith.constant 0 : index
    %0 = vector.load %arg2[%c0, %c0_0, %c0_1] : memref<1x8x32xbf16, #tpu.memory_space<vmem>>, vector<1x8x32xbf16>
    %1 = vector.shape_cast %0 : vector<1x8x32xbf16> to vector<8x32xbf16>
    %c0_2 = arith.constant 0 : index
    %c0_3 = arith.constant 0 : index
    %2 = vector.load %arg4[%c0_2, %c0_3] : memref<32x32xbf16, #tpu.memory_space<vmem>>, vector<32x32xbf16>
    %cst = arith.constant dense<0.000000e+00> : vector<8x32xf32>
    %3 = tpu.matmul %1, %2, %cst {dimension_numbers = #tpu.dot_dimension_numbers<[1], [0], [0], [1], [0, 0, 1, 1], [], []>} : vector<8x32xbf16>, vector<32x32xbf16>, vector<8x32xf32> -> vector<8x32xf32>
    %c0_4 = arith.constant 0 : index
    %c0_5 = arith.constant 0 : index
    %4 = vector.load %arg5[%c0_4, %c0_5] : memref<1x32xf32, #tpu.memory_space<vmem>>, vector<1x32xf32>
    %5 = vector.broadcast %4 : vector<1x32xf32> to vector<8x32xf32>
    %6 = arith.addf %3, %5 : vector<8x32xf32>
    %7 = arith.truncf %6 : vector<8x32xf32> to vector<8x32xbf16>
    %c0_6 = arith.constant 0 : index
    %c0_7 = arith.constant 0 : index
    %c0_8 = arith.constant 0 : index
    %8 = vector.load %arg3[%c0_6, %c0_7, %c0_8] : memref<1x8x32xbf16, #tpu.memory_space<vmem>>, vector<1x8x32xbf16>
    %9 = vector.shape_cast %8 : vector<1x8x32xbf16> to vector<8x32xbf16>
    %c0_9 = arith.constant 0 : index
    %c0_10 = arith.constant 0 : index
    %c0_11 = arith.constant 0 : index
    %10 = vector.load %arg6[%c0_9, %c0_10, %c0_11] : memref<1x1x8xf32, #tpu.memory_space<vmem>>, vector<1x1x8xf32>
    %11 = vector.shape_cast %10 : vector<1x1x8xf32> to vector<1x8xf32>
    %12 = vector.extract_strided_slice %7 {offsets = [0, 0], sizes = [8, 8], strides = [1, 1]} : vector<8x32xbf16> to vector<8x8xbf16>
    %13 = vector.extract_strided_slice %9 {offsets = [0, 0], sizes = [8, 8], strides = [1, 1]} : vector<8x32xbf16> to vector<8x8xbf16>
    %cst_12 = arith.constant dense<0.000000e+00> : vector<8x8xf32>
    %14 = tpu.matmul %12, %13, %cst_12 {dimension_numbers = #tpu.dot_dimension_numbers<[1], [1], [0], [0], [0, 0, 1, 0], [], []>} : vector<8x8xbf16>, vector<8x8xbf16>, vector<8x8xf32> -> vector<8x8xf32>
    %15 = vector.broadcast %11 : vector<1x8xf32> to vector<8x8xf32>
    %16 = arith.addf %14, %15 : vector<8x8xf32>
    %cst_13 = arith.constant dense<0xFF800000> : vector<8xf32>
    %17 = vector.multi_reduction <maximumf>, %16, %cst_13 [1] : vector<8x8xf32> to vector<8xf32>
    %18 = vector.shape_cast %17 : vector<8xf32> to vector<8x1xf32>
    %19 = vector.broadcast %18 : vector<8x1xf32> to vector<8x8xf32>
    %20 = arith.subf %16, %19 : vector<8x8xf32>
    %21 = math.exp %20 : vector<8x8xf32>
    %cst_14 = arith.constant dense<0.000000e+00> : vector<8xf32>
    %22 = vector.multi_reduction <add>, %21, %cst_14 [1] : vector<8x8xf32> to vector<8xf32>
    %23 = vector.shape_cast %22 : vector<8xf32> to vector<8x1xf32>
    %24 = tpu.reciprocal %23 {approx = true} : vector<8x1xf32> -> vector<8x1xf32>
    %25 = vector.broadcast %24 : vector<8x1xf32> to vector<8x8xf32>
    %26 = arith.mulf %21, %25 : vector<8x8xf32>
    %27 = arith.truncf %26 : vector<8x8xf32> to vector<8x8xbf16>
    %c0_15 = arith.constant 0 : index
    %c0_16 = arith.constant 0 : index
    %c0_17 = arith.constant 0 : index
    %c0_18 = arith.constant 0 : index
    %28 = vector.load %arg7[%c0_15, %c0_16, %c0_17, %c0_18] : memref<1x4x8x8xbf16, #tpu.memory_space<vmem>>, vector<1x1x8x8xbf16>
    %29 = vector.shape_cast %28 : vector<1x1x8x8xbf16> to vector<8x8xbf16>
    %30 = vector.shape_cast %27 : vector<8x8xbf16> to vector<1x1x8x8xbf16>
    tpu.vector_store %arg7[%c0_15, %c0_16, %c0_17, %c0_18], %30 {strides = array<i32>} : memref<1x4x8x8xbf16, #tpu.memory_space<vmem>>, vector<1x1x8x8xbf16>,
    %31 = vector.extract_strided_slice %7 {offsets = [0, 8], sizes = [8, 8], strides = [1, 1]} : vector<8x32xbf16> to vector<8x8xbf16>
    %32 = vector.extract_strided_slice %9 {offsets = [0, 8], sizes = [8, 8], strides = [1, 1]} : vector<8x32xbf16> to vector<8x8xbf16>
    %cst_19 = arith.constant dense<0.000000e+00> : vector<8x8xf32>
    %33 = tpu.matmul %31, %32, %cst_19 {dimension_numbers = #tpu.dot_dimension_numbers<[1], [1], [0], [0], [0, 0, 1, 0], [], []>} : vector<8x8xbf16>, vector<8x8xbf16>, vector<8x8xf32> -> vector<8x8xf32>
    %34 = vector.broadcast %11 : vector<1x8xf32> to vector<8x8xf32>
    %35 = arith.addf %33, %34 : vector<8x8xf32>
    %cst_20 = arith.constant dense<0xFF800000> : vector<8xf32>
    %36 = vector.multi_reduction <maximumf>, %35, %cst_20 [1] : vector<8x8xf32> to vector<8xf32>
    %37 = vector.shape_cast %36 : vector<8xf32> to vector<8x1xf32>
    %38 = vector.broadcast %37 : vector<8x1xf32> to vector<8x8xf32>
    %39 = arith.subf %35, %38 : vector<8x8xf32>
    %40 = math.exp %39 : vector<8x8xf32>
    %cst_21 = arith.constant dense<0.000000e+00> : vector<8xf32>
    %41 = vector.multi_reduction <add>, %40, %cst_21 [1] : vector<8x8xf32> to vector<8xf32>
    %42 = vector.shape_cast %41 : vector<8xf32> to vector<8x1xf32>
    %43 = tpu.reciprocal %42 {approx = true} : vector<8x1xf32> -> vector<8x1xf32>
    %44 = vector.broadcast %43 : vector<8x1xf32> to vector<8x8xf32>
    %45 = arith.mulf %40, %44 : vector<8x8xf32>
    %46 = arith.truncf %45 : vector<8x8xf32> to vector<8x8xbf16>
    %c0_22 = arith.constant 0 : index
    %c1 = arith.constant 1 : index
    %c0_23 = arith.constant 0 : index
    %c0_24 = arith.constant 0 : index
    %47 = vector.load %arg7[%c0_22, %c1, %c0_23, %c0_24] : memref<1x4x8x8xbf16, #tpu.memory_space<vmem>>, vector<1x1x8x8xbf16>
    %48 = vector.shape_cast %47 : vector<1x1x8x8xbf16> to vector<8x8xbf16>
    %49 = vector.shape_cast %46 : vector<8x8xbf16> to vector<1x1x8x8xbf16>
    tpu.vector_store %arg7[%c0_22, %c1, %c0_23, %c0_24], %49 {strides = array<i32>} : memref<1x4x8x8xbf16, #tpu.memory_space<vmem>>, vector<1x1x8x8xbf16>,
    %50 = vector.extract_strided_slice %7 {offsets = [0, 16], sizes = [8, 8], strides = [1, 1]} : vector<8x32xbf16> to vector<8x8xbf16>
    %51 = vector.extract_strided_slice %9 {offsets = [0, 16], sizes = [8, 8], strides = [1, 1]} : vector<8x32xbf16> to vector<8x8xbf16>
    %cst_25 = arith.constant dense<0.000000e+00> : vector<8x8xf32>
    %52 = tpu.matmul %50, %51, %cst_25 {dimension_numbers = #tpu.dot_dimension_numbers<[1], [1], [0], [0], [0, 0, 1, 0], [], []>} : vector<8x8xbf16>, vector<8x8xbf16>, vector<8x8xf32> -> vector<8x8xf32>
    %53 = vector.broadcast %11 : vector<1x8xf32> to vector<8x8xf32>
    %54 = arith.addf %52, %53 : vector<8x8xf32>
    %cst_26 = arith.constant dense<0xFF800000> : vector<8xf32>
    %55 = vector.multi_reduction <maximumf>, %54, %cst_26 [1] : vector<8x8xf32> to vector<8xf32>
    %56 = vector.shape_cast %55 : vector<8xf32> to vector<8x1xf32>
    %57 = vector.broadcast %56 : vector<8x1xf32> to vector<8x8xf32>
    %58 = arith.subf %54, %57 : vector<8x8xf32>
    %59 = math.exp %58 : vector<8x8xf32>
    %cst_27 = arith.constant dense<0.000000e+00> : vector<8xf32>
    %60 = vector.multi_reduction <add>, %59, %cst_27 [1] : vector<8x8xf32> to vector<8xf32>
    %61 = vector.shape_cast %60 : vector<8xf32> to vector<8x1xf32>
    %62 = tpu.reciprocal %61 {approx = true} : vector<8x1xf32> -> vector<8x1xf32>
    %63 = vector.broadcast %62 : vector<8x1xf32> to vector<8x8xf32>
    %64 = arith.mulf %59, %63 : vector<8x8xf32>
    %65 = arith.truncf %64 : vector<8x8xf32> to vector<8x8xbf16>
    %c0_28 = arith.constant 0 : index
    %c2 = arith.constant 2 : index
    %c0_29 = arith.constant 0 : index
    %c0_30 = arith.constant 0 : index
    %66 = vector.load %arg7[%c0_28, %c2, %c0_29, %c0_30] : memref<1x4x8x8xbf16, #tpu.memory_space<vmem>>, vector<1x1x8x8xbf16>
    %67 = vector.shape_cast %66 : vector<1x1x8x8xbf16> to vector<8x8xbf16>
    %68 = vector.shape_cast %65 : vector<8x8xbf16> to vector<1x1x8x8xbf16>
    tpu.vector_store %arg7[%c0_28, %c2, %c0_29, %c0_30], %68 {strides = array<i32>} : memref<1x4x8x8xbf16, #tpu.memory_space<vmem>>, vector<1x1x8x8xbf16>,
    %69 = vector.extract_strided_slice %7 {offsets = [0, 24], sizes = [8, 8], strides = [1, 1]} : vector<8x32xbf16> to vector<8x8xbf16>
    %70 = vector.extract_strided_slice %9 {offsets = [0, 24], sizes = [8, 8], strides = [1, 1]} : vector<8x32xbf16> to vector<8x8xbf16>
    %cst_31 = arith.constant dense<0.000000e+00> : vector<8x8xf32>
    %71 = tpu.matmul %69, %70, %cst_31 {dimension_numbers = #tpu.dot_dimension_numbers<[1], [1], [0], [0], [0, 0, 1, 0], [], []>} : vector<8x8xbf16>, vector<8x8xbf16>, vector<8x8xf32> -> vector<8x8xf32>
    %72 = vector.broadcast %11 : vector<1x8xf32> to vector<8x8xf32>
    %73 = arith.addf %71, %72 : vector<8x8xf32>
    %cst_32 = arith.constant dense<0xFF800000> : vector<8xf32>
    %74 = vector.multi_reduction <maximumf>, %73, %cst_32 [1] : vector<8x8xf32> to vector<8xf32>
    %75 = vector.shape_cast %74 : vector<8xf32> to vector<8x1xf32>
    %76 = vector.broadcast %75 : vector<8x1xf32> to vector<8x8xf32>
    %77 = arith.subf %73, %76 : vector<8x8xf32>
    %78 = math.exp %77 : vector<8x8xf32>
    %cst_33 = arith.constant dense<0.000000e+00> : vector<8xf32>
    %79 = vector.multi_reduction <add>, %78, %cst_33 [1] : vector<8x8xf32> to vector<8xf32>
    %80 = vector.shape_cast %79 : vector<8xf32> to vector<8x1xf32>
    %81 = tpu.reciprocal %80 {approx = true} : vector<8x1xf32> -> vector<8x1xf32>
    %82 = vector.broadcast %81 : vector<8x1xf32> to vector<8x8xf32>
    %83 = arith.mulf %78, %82 : vector<8x8xf32>
    %84 = arith.truncf %83 : vector<8x8xf32> to vector<8x8xbf16>
    %c0_34 = arith.constant 0 : index
    %c3 = arith.constant 3 : index
    %c0_35 = arith.constant 0 : index
    %c0_36 = arith.constant 0 : index
    %85 = vector.load %arg7[%c0_34, %c3, %c0_35, %c0_36] : memref<1x4x8x8xbf16, #tpu.memory_space<vmem>>, vector<1x1x8x8xbf16>
    %86 = vector.shape_cast %85 : vector<1x1x8x8xbf16> to vector<8x8xbf16>
    %87 = vector.shape_cast %84 : vector<8x8xbf16> to vector<1x1x8x8xbf16>
    tpu.vector_store %arg7[%c0_34, %c3, %c0_35, %c0_36], %87 {strides = array<i32>} : memref<1x4x8x8xbf16, #tpu.memory_space<vmem>>, vector<1x1x8x8xbf16>,
    return
  }
  func.func @transform_0(%arg0: i32, %arg1: i32) -> (i32, i32, i32) {
    %c0_i32 = arith.constant 0 : i32
    %c0_i32_0 = arith.constant 0 : i32
    return %arg0, %arg1, %c0_i32 : i32, i32, i32
  }
  func.func @transform_1(%arg0: i32, %arg1: i32) -> (i32, i32, i32) {
    %c0_i32 = arith.constant 0 : i32
    %c0_i32_0 = arith.constant 0 : i32
    %c0_i32_1 = arith.constant 0 : i32
    return %arg0, %c0_i32, %c0_i32_0 : i32, i32, i32
  }
  func.func @transform_2(%arg0: i32, %arg1: i32) -> (i32, i32) {
    %c0_i32 = arith.constant 0 : i32
    %c0_i32_0 = arith.constant 0 : i32
    %c0_i32_1 = arith.constant 0 : i32
    return %c0_i32, %c0_i32_0 : i32, i32
  }
  func.func @transform_3(%arg0: i32, %arg1: i32) -> (i32, i32) {
    %c0_i32 = arith.constant 0 : i32
    %c0_i32_0 = arith.constant 0 : i32
    %c0_i32_1 = arith.constant 0 : i32
    return %c0_i32, %c0_i32_0 : i32, i32
  }
  func.func @transform_4(%arg0: i32, %arg1: i32) -> (i32, i32, i32) {
    %c0_i32 = arith.constant 0 : i32
    %c0_i32_0 = arith.constant 0 : i32
    %c0_i32_1 = arith.constant 0 : i32
    return %arg0, %c0_i32, %c0_i32_0 : i32, i32, i32
  }
  func.func @transform_5(%arg0: i32, %arg1: i32) -> (i32, i32, i32, i32) {
    %c0_i32 = arith.constant 0 : i32
    %c0_i32_0 = arith.constant 0 : i32
    %c0_i32_1 = arith.constant 0 : i32
    return %arg0, %c0_i32, %arg1, %c0_i32_0 : i32, i32, i32, i32
  }
}

</mosaic_0001>

<bundles_post_ra>
// kernel: tpu_custom_call.1
= control target key start
LH: loop header
LB: loop body
LE: loop exit
PB: predicated region body
PF: predicated region fallthrough
CT: control target
= control target key end

     0   :  { %s1484_s0 = inlined_call_operand.hbm [shape: bf16[2,8,32], index: 0, kind: input, shape index: {}]   ;;  %s1485_s1 = inlined_call_operand.hbm [shape: bf16[2,8,32], index: 1, kind: input, shape index: {}]   ;;  %s1486_s2 = inlined_call_operand.hbm [shape: bf16[32,32], index: 2, kind: input, shape index: {}]   ;;  %s1487_s3 = inlined_call_operand.vmem [shape: f32[1,32], index: 3, kind: input, shape index: {}]   ;;  %s1488_s4 = inlined_call_operand.vmem [shape: f32[2,1,8], index: 4, kind: input, shape index: {}]   ;;  %s1489_s5 = inlined_call_operand.hbm [shape: bf16[2,4,8,8], index: 5, kind: output, shape index: {}]  }
   0x1   :  { %1496 = sst [smem:[#allocation16_spill]] %s1486_s2 }
   0x2   :  { %10 = vsyncpa [#allocation3], 0 }
   0x3   :  { %12 = vsyncpa [#allocation3 + $0x1], 0 }
   0x4   :  { %13 = vsyncpa [#allocation6], 0 }
   0x5   :  { %15 = vsyncpa [#allocation6 + $0x1], 0 }
   0x6   :  { %16 = vsyncpa [#allocation4], 0 }
   0x7   :  { %18 = vsyncpa [#allocation4 + $0x1], 0  ;;  %s1202_s18 = smov 0   ;;  %s1204_s19 = smov 0  }
   0x8   :  { %s1206_s20 = smov 0   ;;  %s1208_s21 = smov 0  }
   0x9   :  { %s1210_s22 = smov 0   ;;  %s1212_s23 = smov 0  }
   0xa LB: > { %1497 = sst [smem:[#allocation13_spill]] %s1153_s22  ;;  %s1233_s24 = sadd.s32 4294967295, %s1157_s23   ;;  %s1157_s23 = sphi %s1212_s23, %s24_s23   ;;  %s1153_s22 = sphi %s1210_s22, %s1518_s22   ;;  %s1149_s21 = sphi %s1208_s21, %s1517_s21   ;;  %s1145_s20 = sphi %s1206_s20, %s1521_s20   ;;  %s1141_s19 = sphi %s1204_s19, %s1520_s19   ;;  %s1137_s18 = sphi %s1202_s18, %s1519_s18  }
   0xb   : > { %s798_s25 = sadd.s32 4294967294, %s1157_s23   ;;  %p58_p0 = scmp.ne.s32.totalorder %s1141_s19, %s1137_s18 }
   0xc   : > { %p1490_p1 = scmp.eq.s32.totalorder %s1233_s24, 0  ;;  %p184_p3 = scmp.eq.s32.totalorder %s798_s25, 1 }
   0xd   : > { %p799_p5 = scmp.ge.s32.totalorder %s1157_s23, 1  ;;  %p191_p7 = scmp.lt.s32.totalorder %s1157_s23, 3 }
   0xe   : > { %p1242_p4 = por %p1490_p1, %p58_p0  ;;  %p1247_p6 = por %p184_p3, %p58_p0 }
   0xf   : > { %p1252_p8 = pnand %p799_p5, %p191_p7  ;;  %s1159_s29 = smov [#allocation7]  }
  0x10   : > { %s1498_s26 = scalar_select %p1242_p4, 1, 0 }
  0x11   : > { %s1499_s27 = scalar_select %p1247_p6, 1, 0 }
  0x12   : > { %s1500_s28 = scalar_select %p1252_p8, 1, 0 }
  0x13   : > { %s203_s30 = sshll.u32 %s1159_s29, 4  ;;  %p883_p9 = pneg %p1252_p8  ;;  %s204_s30 = int_to_ptr.vmem [resolvable:$true] %s203_s30 }
  0x14   : > { %s36_s7 = sadd.s32 1, %s1153_s22  ;;  %s1502_s2 = sld [smem:[#allocation16_spill]] }
  0x15   : > { %p1261_p11 = pnand %p883_p9, %p1490_p1 }
  0x17   : > { %p981_p13 = pneg %p1261_p11 }
  0x1a   : > { %s979_s10 = scalar_lea.hbm %s1502_s2, 256 }
  0x1b   : > { %p980_p12 = scmp.ne.s32.totalorder %s1502_s2, %s979_s10  ;;  %p986_p5 = scmp.lt.u32.totalorder %s979_s10, %s1502_s2 }
  0x1d   : > { %p982_p0 = pnand %p981_p13, %p980_p12 }
  0x1f   : > { %p983_p3 = pneg %p982_p0 }
  0x21   : > { %p988_p7 = pnand %p986_p5, %p983_p3 }
  0x23   : > { %991 = shalt.err (!%p988_p7)
}
  0x24   : > { %s992_s15 = scalar_lea.vmem %s204_s30, 256  ;;  %p1000_p2 = scmp.lt.s32.totalorder %s204_s30, %s204_s30 }
  0x25   : > { %p993_p9 = scmp.ne.s32.totalorder %s204_s30, %s992_s15  ;;  %p1001_p6 = scmp.lt.s32.totalorder %s992_s15, %s992_s15 }
  0x27   : > { %p995_p10 = pnand %p993_p9, %p981_p13  ;;  %p1002_p4 = por %p1001_p6, %p1000_p2 }
  0x29   : > { %p996_p1 = pneg %p995_p10 }
  0x2b   : > { %p1003_p8 = pnand %p1002_p4, %p996_p1 }
  0x2d   : > { %1006 = shalt.err (!%p1003_p8)
}
  0x2e   : > { %s1160_s16 = smov 64   ;;  %s1161_s17 = smov 4  }
  0x2f   : > { %886 = dma.hbm_to_vmem [thread:$0]  (!%p1261_p11), %s1502_s2, 256, %s204_s30, [#allocation6], %s1160_s16, %s1160_s16, %s1161_s17  }
  0x30   : > { %p38_p1 = scmp.ge.s32.totalorder %s36_s7, 2  ;;  %s45_s8 = sadd.s32 1, %s1145_s20 }
  0x31   : > { %p52_p2 = scmp.ne.s32.totalorder %s1145_s20, %s1141_s19  ;;  %p53_p4 = scmp.eq.s32.totalorder %s1157_s23, 0 }
  0x32   : > { %s1523_s7 = smov (%p38_p1, %s36_s7), 0  ;;  %p1505_p8 = scmp.eq.s32.totalorder %s1233_s24, 1 }
  0x33   : > { %1503 = sst [smem:[#allocation14_spill]] %s1523_s7  ;;  %p1288_p6 = por %p53_p4, %p52_p2 }
  0x34   : > { %p1294_p10 = por %p1505_p8, %p52_p2  ;;  %s40_s10 = ssub.s32 %s1153_s22, %s1523_s7 }
  0x35   : > { %p899_p11 = scmp.lt.s32.totalorder %s1157_s23, 2  ;;  %p43_p12 = scmp.eq.s32.totalorder %s40_s10, 0 }
  0x36   : > { %s1506_s6 = scalar_select %p1294_p10, 1, 0 }
  0x37   : > { %s220_s30 = sand.u32 1, %s1145_s20   ;;  %s803_s13 = sshll.u32 %s1153_s22, 6 }
  0x38   : > { %s1302_s11 = sshll.u32 %s220_s30, 2  ;;  %s1311_s16 = scalar_lea.hbm %s1484_s0, %s803_s13 }
  0x39   : > { %s1305_s12 = scalar_select %p43_p12, %s1145_s20, %s45_s8  }
  0x3a   : > { %s224_s17 = scalar_lea.vmem [#allocation2], %s1302_s11  ;;  %p1318_p13 = pnand %p899_p11, %p1288_p6 }
  0x3b   : > { %1507 = sst [smem:[#allocation15_spill]] %s1305_s12  ;;  %s232_s25 = sshll.u32 %s224_s17, 4  ;;  %s1314_s25 = int_to_ptr.vmem [resolvable:$true] %s232_s25 }
  0x3c   : > { %s1325_s14 = scalar_lea.hbm %s1485_s1, %s803_s13  ;;  %s239_s15 = sand.u32 1, %s1157_s23  }
  0x3d   : > { %s221_s2 = scalar_lea.sflag [#allocation3], %s220_s30  ;;  %s1007_s7 = scalar_lea.hbm %s1311_s16, 64 }
  0x3e   : > { %p1008_p0 = scmp.ne.s32.totalorder %s1311_s16, %s1007_s7  ;;  %p1009_p3 = pneg %p1318_p13 }
  0x3f   : > { %s1012_s22 = scalar_lea.hbm %s1484_s0, 128  ;;  %p1013_p9 = scmp.lt.u32.totalorder %s1311_s16, %s1484_s0 }
  0x40   : > { %p1010_p5 = pnand %p1009_p3, %p1008_p0  ;;  %p1014_p1 = scmp.lt.u32.totalorder %s1012_s22, %s1007_s7 }
  0x41   : > { %p1016_p4 = scmp.lt.u32.totalorder %s1007_s7, %s1311_s16 }
  0x42   : > { %p1011_p7 = pneg %p1010_p5  ;;  %p1015_p2 = por %p1014_p1, %p1013_p9 }
  0x44   : > { %p1017_p6 = por %p1016_p4, %p1015_p2 }
  0x46   : > { %p1018_p8 = pnand %p1017_p6, %p1011_p7 }
  0x48   : > { %1021 = shalt.err (!%p1018_p8)
}
  0x49   : > { %s1022_s30 = scalar_lea.vmem %s1314_s25, 64  ;;  %s1162_s13 = smov [#allocation2]  }
  0x4a   : > { %p1023_p11 = scmp.ne.s32.totalorder %s1314_s25, %s1022_s30  ;;  %s1027_s10 = sshll.u32 %s1162_s13, 4  ;;  %s1028_s10 = int_to_ptr.vmem [resolvable:$false] %s1027_s10 }
  0x4b   : > { %s1029_s12 = scalar_lea.vmem %s1028_s10, 128  ;;  %p1030_p5 = scmp.lt.s32.totalorder %s1314_s25, %s1028_s10 }
  0x4c   : > { %p1025_p12 = pnand %p1023_p11, %p1009_p3  ;;  %p1031_p9 = scmp.lt.s32.totalorder %s1029_s12, %s1022_s30 }
  0x4e   : > { %p1026_p0 = pneg %p1025_p12  ;;  %p1032_p1 = por %p1031_p9, %p1030_p5 }
  0x50   : > { %p1033_p2 = pnand %p1032_p1, %p1026_p0 }
  0x52   : > { %1036 = shalt.err (!%p1033_p2)
}
  0x53   : > { %890 = dma.hbm_to_vmem [thread:$0]  (!%p1318_p13), %s1311_s16, 64, %s1314_s25, %s221_s2  }
  0x54   : > { %s243_s22 = scalar_lea.vmem [#allocation5], %s1302_s11  ;;  %s240_s9 = scalar_lea.sflag [#allocation6], %s239_s15 }
  0x55   : > { %s250_s7 = sshll.u32 %s243_s22, 4  ;;  %s1037_s17 = scalar_lea.hbm %s1325_s14, 64  ;;  %s251_s7 = int_to_ptr.vmem [resolvable:$true] %s250_s7 }
  0x56   : > { %p1038_p7 = scmp.ne.s32.totalorder %s1325_s14, %s1037_s17  ;;  %s1042_s13 = scalar_lea.hbm %s1485_s1, 128 }
  0x57   : > { %p1043_p8 = scmp.lt.u32.totalorder %s1325_s14, %s1485_s1  ;;  %p1044_p11 = scmp.lt.u32.totalorder %s1042_s13, %s1037_s17 }
  0x58   : > { %p1040_p4 = pnand %p1038_p7, %p1009_p3  ;;  %p1046_p0 = scmp.lt.u32.totalorder %s1037_s17, %s1325_s14 }
  0x59   : > { %p1045_p12 = por %p1044_p11, %p1043_p8 }
  0x5a   : > { %p1041_p6 = pneg %p1040_p4 }
  0x5b   : > { %p1047_p5 = por %p1046_p0, %p1045_p12 }
  0x5d   : > { %p1048_p9 = pnand %p1047_p5, %p1041_p6 }
  0x5f   : > { %1051 = shalt.err (!%p1048_p9)
}
  0x60   : > { %s1052_s2 = scalar_lea.vmem %s251_s7, 64  ;;  %s1163_s11 = smov [#allocation5]  }
  0x61   : > { %p1053_p1 = scmp.ne.s32.totalorder %s251_s7, %s1052_s2  ;;  %s1057_s16 = sshll.u32 %s1163_s11, 4  ;;  %s1058_s16 = int_to_ptr.vmem [resolvable:$false] %s1057_s16 }
  0x62   : > { %s1059_s25 = scalar_lea.vmem %s1058_s16, 128  ;;  %p1060_p4 = scmp.lt.s32.totalorder %s251_s7, %s1058_s16 }
  0x63   : > { %p1055_p2 = pnand %p1053_p1, %p1009_p3  ;;  %p1061_p10 = scmp.lt.s32.totalorder %s1059_s25, %s1052_s2 }
  0x65   : > { %p1056_p7 = pneg %p1055_p2  ;;  %p1062_p8 = por %p1061_p10, %p1060_p4 }
  0x67   : > { %p1063_p11 = pnand %p1062_p8, %p1056_p7 }
  0x69   : > { %1066 = shalt.err (!%p1063_p11)
}
  0x6a   : > { %893 = dma.hbm_to_vmem [thread:$0]  (!%p1318_p13), %s1325_s14, 64, %s251_s7, %s240_s9  }
  0x6b   : > { %p1509_p6 = scmp.ne.s32.totalorder %s1500_s28, 0 }
  0x6c   : > { %s1378_s15 = sand.u32 (!%p1509_p6), 1, %s1141_s19   ;;  %p1510_p3 = scmp.ne.s32.totalorder (!%p1509_p6), %s1498_s26, 0 }
  0x6d   : > { %265 = sbr.rel (%p1509_p6) target bundleno = 1017 (0x3f9), region = 40  ;;  %s807_s22 = sshll.u32 (!%p1509_p6), %s1378_s15, 2 }
  0x6e   : > { %s268_s17 = scalar_lea.sflag (!%p1509_p6), [#allocation3], %s1378_s15  ;;  %s271_s8 = scalar_lea.vmem (!%p1509_p6), [#allocation2], %s807_s22 }
  0x74   : > { %1120 = dma.done.wait (%p1510_p3), %s268_s17, 64  }
  0x75   : > { %1122 = vsyncadd (%p1510_p3), %s268_s17, 4294967232  ;;  %s276_s29 = sand.u32 1, %s1233_s24   ;;  %s280_s28 = scalar_lea.vmem [#allocation5], %s807_s22 }
  0x76   : > { %s277_s14 = scalar_lea.sflag [#allocation6], %s276_s29 }
  0x77   : > { %1124 = dma.done.wait (%p1510_p3), %s277_s14, 64  }
  0x78   : > { %1126 = vsyncadd (%p1510_p3), %s277_s14, 4294967232  ;;  %p1511_p10 = scmp.eq.s32.totalorder %s1233_s24, 0 }
  0x7a   : > { %1128 = dma.done.wait (%p1511_p10), [#allocation6], 256   ;;  %p1512_p13 = pmov %p1511_p10 }
  0x7b   : > { %v1164_v0 = vmov 0.0   ;;  %vm1165_vm0 = vmmov 0   ;;  %v960_v1 = vld [vmem:[#allocation7] sm:$0xff]   ;;  %vm400_vm1 = vcmask 64512   ;;  %v961_v2 = vld [vmem:[#allocation7 + $0x8] sm:$0xff]   ;;  %s1166_s24 = smov 120  }
  0x7c   : > { %1130 = vsyncadd (%p1512_p13), [#allocation6], 4294967040  ;;  %841 = vmatprep.subr.bf16.mxu0 %v1164_v0  ;;  %845 = vmatprep.mubr.msk.bf16.mxu0 %vm1165_vm0, %v1164_v0  ;;  %v392_v3 = vld [vmem:[%s280_s28] sm:$0xf]  ;;  %s1167_s26 = smov 112   ;;  %vm347_vm2 = vcmask 261120  }
  0x7d   : > { %849 = vmatprep.subr.bf16.mxu1 %v1164_v0  ;;  %851 = vmatprep.mubr.msk.bf16.mxu1 %vm1165_vm0, %v1164_v0  ;;  %v817_v4 = vcombine.low %v392_v3, %v392_v3  ;;  %v405_v5 = vsel %vm400_vm1, %v392_v3, 0  ;;  %v323_v6 = vld [vmem:[%s271_s8] sm:$0xf]  ;;  %s1168_s7 = smov 104   ;;  %p319_p12 = scmp.lt.s32.totalorder %s1149_s21, 1  ;;  %vm459_vm3 = vcmask 60416  }
  0x7e   : > { %842 = vmatpush3.bf16.msra.mxu0 %v960_v1  ;;  %850 = vmatpush3.bf16.xpose.msra.mxu1 %v405_v5  ;;  %v811_v9 = vld [vmem:[%s1487_s3] ss:$0 sm:$0xff]  ;;  %s810_s11 = sshll.u32 %s1378_s15, 4  ;;  %s829_s25 = sshll.u32 %s1149_s21, 8 }
  0x7f   : > { %843 = vmatprep.subr.bf16.mxu0 %v1164_v0  ;;  %467 = vrot.lane.b32.xlu0 %v817_v4, %s1166_s24  ;;  %s320_s13 = scalar_select %p319_p12, %s1149_s21, 1 }
  0x80   : > { %531 = vrot.lane.b32.xlu1 %v817_v4, %s1167_s26  ;;  %861 = vmatprep.subr.bf16.mxu1 %v1164_v0  ;;  %s318_s16 = scalar_lea.vmem [#allocation8], %s810_s11  ;;  %s1432_s29 = scalar_lea.hbm %s1489_s5, %s829_s25 }
  0x81   : > { %s321_s2 = scalar_lea.vmem %s1488_s4, %s320_s13  ;;  %s672_s22 = sshll.u32 %s318_s16, 4  ;;  %s1434_s22 = int_to_ptr.vmem [resolvable:$true] %s672_s22 }
  0x82   : > { %844 = vmatpush3.bf16.msra.mxu0 %v961_v2  ;;  %v815_v23 = vld [vmem:[%s321_s2] ss:$0 sm:$0xff]  ;;  %s658_s14 = scalar_lea.sflag [#allocation4], %s1378_s15  ;;  %s1067_s21 = scalar_lea.vmem %s1434_s22, 256 }
  0x83   : > { %855 = vmatprep.subr.bf16.mxu0 %v1164_v0  ;;  %p1068_p0 = scmp.ne.s32.totalorder %s1434_s22, %s1067_s21  ;;  %p1513_p5 = scmp.ne.s32.totalorder %s1506_s6, 0 }
  0x84   : > { %595 = vrot.lane.b32.xlu1 %v817_v4, %s1168_s7  ;;  %s1169_s28 = smov [#allocation8]  }
  0x85   : > { %846 = vmatmul.mubr.msk.bf16.vlgmr.msra.gmra.mrb[0].mxu0 %vm347_vm2, %v323_v6  ;;  %p1069_p9 = pnand %p1068_p0, %p1513_p5 }
  0x86   : > { %857 = vmatprep.mubr.msk.bf16.mxu0 %vm1165_vm0, %v1164_v0 }
  0x87   : > { %p1070_p1 = pneg %p1069_p9 }
  0xf1   : > { %v468_v7 = vpop.permute.xlu0 %467 }
  0xf2   : > { %v473_v8 = vsel %vm400_vm1, %v468_v7, 0  ;;  %v532_v16 = vpop.permute.xlu1 %531 }
  0xf3   : > { %856 = vmatpush3.bf16.xpose.msra.mxu0 %v473_v8  ;;  %v537_v17 = vsel %vm400_vm1, %v532_v16, 0 }
  0xf4   : > { %867 = vmatprep.subr.bf16.mxu0 %v1164_v0 }
  0xf6   : > { %v596_v18 = vpop.permute.xlu1 %595 }
  0xf7   : > { %v601_v19 = vsel %vm400_vm1, %v596_v18, 0 }
 0x158   : > { %v385_v10 = vpop.f32.mrb[0].mxu0 }
 0x159   : > { %v386_v11 = vadd.f32 %v811_v9, %v385_v10  ;;  %v847_v12 = vpop.f32.mrb[1].mxu0 }
 0x15a   : > { %v388_v13 = vpop.f32.mrb[2].mxu0 }
 0x15b   : > { %v391_v14 = vpack.c.bf16 %v386_v11, %v386_v11  ;;  %v848_v15 = vpop.f32.mrb[3].mxu0 }
 0x15d   : > { %593 = vrot.lane.b32.xlu1 %v391_v14, %s1168_s7  ;;  %462 = vrot.lane.b32.xlu0 %v391_v14, %s1166_s24  ;;  %s1071_s24 = sshll.u32 %s1169_s28, 4  ;;  %s1072_s24 = int_to_ptr.vmem [resolvable:$false] %s1071_s24 }
 0x15e   : > { %852 = vmatmul.mubr.msk.bf16.vlgmr.msra.gmra.mrb[0].mxu1 %vm400_vm1, %v391_v14  ;;  %p1074_p2 = scmp.lt.s32.totalorder %s1434_s22, %s1072_s24 }
 0x15f   : > { %862 = vmatpush3.bf16.xpose.msra.mxu1 %v537_v17  ;;  %863 = vmatprep.mubr.msk.bf16.mxu1 %vm1165_vm0, %v1164_v0 }
 0x161   : > { %529 = vrot.lane.b32.xlu0 %v391_v14, %s1167_s26  ;;  %s1073_s26 = scalar_lea.vmem %s1072_s24, 512 }
 0x162   : > { %p1075_p7 = scmp.lt.s32.totalorder %s1073_s26, %s1067_s21 }
 0x164   : > { %p1076_p4 = por %p1075_p7, %p1074_p2 }
 0x166   : > { %p1077_p8 = pnand %p1076_p4, %p1070_p1 }
 0x1cf   : > { %v463_v20 = vpop.permute.xlu0 %462  ;;  %v594_v22 = vpop.permute.xlu1 %593 }
 0x1d0   : > { %858 = vmatmul.mubr.msk.bf16.vlgmr.msra.gmra.mrb[4].mxu0 %vm400_vm1, %v463_v20 }
 0x1d1   : > { %868 = vmatpush3.bf16.xpose.msra.mxu0 %v601_v19  ;;  %869 = vmatprep.mubr.msk.bf16.mxu0 %vm1165_vm0, %v1164_v0 }
 0x1d3   : > { %v530_v21 = vpop.permute.xlu0 %529 }
 0x1d4   : > { %864 = vmatmul.mubr.msk.bf16.vlgmr.msra.gmra.mrb[4].mxu1 %vm400_vm1, %v530_v21 }
 0x1d8   : > { %870 = vmatmul.mubr.msk.bf16.vlgmr.msra.gmra.mrb[8].mxu0 %vm400_vm1, %v594_v22 }
 0x231   : > { %v441_v24 = vpop.f32.mrb[0].mxu1 }
 0x232   : > { %v442_v25 = vadd.f32 %v815_v23, %v441_v24  ;;  %v853_v26 = vpop.f32.mrb[1].mxu1 }
 0x233   : > { %v444_v27 = vpop.f32.mrb[2].mxu1 }
 0x234   : > { %v854_v28 = vpop.f32.mrb[3].mxu1  ;;  %v447_v29 = vsel %vm400_vm1, %v442_v25, -inf }
 0x235   : > { %448 = vmax.xlane.f32.xlu0 %v447_v29 }
 0x2a3   : > { %v509_v30 = vpop.f32.mrb[4].mxu0 }
 0x2a4   : > { %v510_v31 = vadd.f32 %v815_v23, %v509_v30  ;;  %v859_v32 = vpop.f32.mrb[5].mxu0 }
 0x2a5   : > { %v512_v33 = vpop.f32.mrb[6].mxu0 }
 0x2a6   : > { %v860_v34 = vpop.f32.mrb[7].mxu0  ;;  %v515_v35 = vsel %vm400_vm1, %v510_v31, -inf }
 0x2a7   : > { %v573_v36 = vpop.f32.mrb[4].mxu1  ;;  %516 = vmax.xlane.f32.xlu1 %v515_v35 }
 0x2a8   : > { %v574_v37 = vadd.f32 %v815_v23, %v573_v36  ;;  %v865_v38 = vpop.f32.mrb[5].mxu1 }
 0x2a9   : > { %v576_v39 = vpop.f32.mrb[6].mxu1 }
 0x2aa   : > { %v866_v40 = vpop.f32.mrb[7].mxu1  ;;  %v579_v41 = vsel %vm400_vm1, %v574_v37, -inf }
 0x2ab   : > { %580 = vmax.xlane.f32.xlu0 %v579_v41  ;;  %v637_v42 = vpop.f32.mrb[8].mxu0 }
 0x2ac   : > { %v638_v43 = vadd.f32 %v815_v23, %v637_v42  ;;  %v871_v44 = vpop.f32.mrb[9].mxu0 }
 0x2ad   : > { %v640_v45 = vpop.f32.mrb[10].mxu0 }
 0x2ae   : > { %v872_v46 = vpop.f32.mrb[11].mxu0  ;;  %v643_v47 = vsel %vm400_vm1, %v638_v43, -inf }
 0x2af   : > { %644 = vmax.xlane.f32.xlu0 %v643_v47 }
 0x2c2   : > { %v449_v48 = vpop.xlane.xlu0 %448 }
 0x2c3   : > { %v450_v49 = vsub.f32 %v442_v25, %v449_v48 }
 0x2c5   : > { %v451_v50 = vmul.f32 1.442695, %v450_v49 }
 0x2c7   : > { %963 = vpow2.f32 %v451_v50 }
 0x2d1   : > { %v964_v51 = vpop.eup %963 }
 0x2d2   : > { %v453_v52 = vsel %vm400_vm1, %v964_v51, 0.0 }
 0x2d3   : > { %454 = vadd.xlane.f32.xlu1 %v453_v52 }
 0x334   : > { %v517_v53 = vpop.xlane.xlu1 %516 }
 0x335   : > { %v518_v54 = vsub.f32 %v510_v31, %v517_v53 }
 0x337   : > { %v519_v55 = vmul.f32 1.442695, %v518_v54 }
 0x338   : > { %v581_v56 = vpop.xlane.xlu0 %580 }
 0x339   : > { %965 = vpow2.f32 %v519_v55  ;;  %v582_v57 = vsub.f32 %v574_v37, %v581_v56 }
 0x33b   : > { %v583_v58 = vmul.f32 1.442695, %v582_v57 }
 0x33c   : > { %v645_v59 = vpop.xlane.xlu0 %644 }
 0x33d   : > { %967 = vpow2.f32 %v583_v58  ;;  %v646_v60 = vsub.f32 %v638_v43, %v645_v59 }
 0x33f   : > { %v647_v61 = vmul.f32 1.442695, %v646_v60 }
 0x341   : > { %969 = vpow2.f32 %v647_v61 }
 0x343   : > { %v966_v62 = vpop.eup %965 }
 0x344   : > { %v521_v63 = vsel %vm400_vm1, %v966_v62, 0.0 }
 0x345   : > { %522 = vadd.xlane.f32.xlu0 %v521_v63 }
 0x347   : > { %v968_v0 = vpop.eup %967 }
 0x348   : > { %v585_v1 = vsel %vm400_vm1, %v968_v0, 0.0 }
 0x349   : > { %586 = vadd.xlane.f32.xlu1 %v585_v1 }
 0x34b   : > { %v970_v2 = vpop.eup %969 }
 0x34c   : > { %v649_v3 = vsel %vm400_vm1, %v970_v2, 0.0 }
 0x34d   : > { %650 = vadd.xlane.f32.xlu0 %v649_v3 }
 0x360   : > { %v455_v4 = vpop.xlane.xlu1 %454 }
 0x361   : > { %971 = vrcp.f32 %v455_v4 }
 0x36b   : > { %v972_v5 = vpop.eup %971 }
 0x36c   : > { %v457_v6 = vmul.f32 %v972_v5, %v964_v51 }
 0x36e   : > { %v458_v7 = vpack.c.bf16 %v457_v6, %v457_v6 }
 0x370   : > { %460 = vst.msk [vmem:[%s318_s16] sm:$0xf] %vm459_vm3, %v458_v7 }
 0x3d2   : > { %v523_v8 = vpop.xlane.xlu0 %522 }
 0x3d3   : > { %973 = vrcp.f32 %v523_v8 }
 0x3d6   : > { %v587_v9 = vpop.xlane.xlu1 %586 }
 0x3d7   : > { %975 = vrcp.f32 %v587_v9 }
 0x3da   : > { %v651_v10 = vpop.xlane.xlu0 %650 }
 0x3db   : > { %977 = vrcp.f32 %v651_v10 }
 0x3dd   : > { %v974_v11 = vpop.eup %973 }
 0x3de   : > { %v525_v12 = vmul.f32 %v974_v11, %v966_v62 }
 0x3e0   : > { %v526_v13 = vpack.c.bf16 %v525_v12, %v525_v12 }
 0x3e1   : > { %v976_v14 = vpop.eup %975 }
 0x3e2   : > { %819 = vst.msk [vmem:[%s318_s16 + $0x4] sm:$0xf] %vm459_vm3, %v526_v13  ;;  %v589_v15 = vmul.f32 %v976_v14, %v968_v0 }
 0x3e4   : > { %v590_v16 = vpack.c.bf16 %v589_v15, %v589_v15 }
 0x3e5   : > { %v978_v17 = vpop.eup %977 }
 0x3e6   : > { %821 = vst.msk [vmem:[%s318_s16 + $0x8] sm:$0xf] %vm459_vm3, %v590_v16  ;;  %v653_v18 = vmul.f32 %v978_v17, %v970_v2 }
 0x3e8   : > { %v654_v19 = vpack.c.bf16 %v653_v18, %v653_v18 }
 0x3ea   : > { %823 = vst.msk [vmem:[%s318_s16 + $0xc] sm:$0xf] %vm459_vm3, %v654_v19 }
 0x3eb   : > { %1080 = shalt.err (!%p1077_p8)
}
 0x3ec   : > { %s1081_s7 = scalar_lea.hbm %s1432_s29, 256  ;;  %s1085_s13 = scalar_lea.hbm %s1489_s5, 512 }
 0x3ed   : > { %p1082_p11 = scmp.ne.s32.totalorder %s1432_s29, %s1081_s7  ;;  %p1086_p10 = scmp.lt.u32.totalorder %s1432_s29, %s1489_s5 }
 0x3ee   : > { %p1087_p13 = scmp.lt.u32.totalorder %s1085_s13, %s1081_s7  ;;  %p1089_p0 = scmp.lt.u32.totalorder %s1081_s7, %s1432_s29 }
 0x3ef   : > { %p1083_p6 = pnand %p1082_p11, %p1513_p5 }
 0x3f0   : > { %p1088_p12 = por %p1087_p13, %p1086_p10 }
 0x3f1   : > { %p1084_p3 = pneg %p1083_p6 }
 0x3f2   : > { %p1090_p9 = por %p1089_p0, %p1088_p12 }
 0x3f4   : > { %p1091_p1 = pnand %p1090_p9, %p1084_p3 }
 0x3f6   : > { %1094 = shalt.err (!%p1091_p1)
}
 0x3f7   : > { %s1170_s2 = smov 64   ;;  %s1171_s11 = smov 4  }
 0x3f8   : > { %881 = dma.vmem_to_hbm [thread:$0]  (%p1513_p5), %s1434_s22, 256, %s1432_s29, %s658_s14, %s1170_s2, %s1170_s2, %s1171_s11  }
 0x3f9 PF: > { %s687_s16 = sand.u32 1, %s1137_s18   ;;  %p1514_p2 = scmp.ne.s32.totalorder %s1499_s27, 0 }
 0x3fa   : > { %p1515_p7 = scmp.ge.s32.totalorder %s1157_s23, 2  ;;  %s688_s25 = scalar_lea.sflag [#allocation4], %s687_s16 }
 0x3fc   : > { %p895_p4 = pnand %p1515_p7, %p1514_p2 }
 0x3fe   : > { %1132 = dma.done.wait (!%p895_p4), %s688_s25, 256  }
 0x3ff   : > { %1134 = vsyncadd (!%p895_p4), %s688_s25, 4294967040  ;;  %s24_s23 = sadd.s32 1, %s1157_s23   ;;  %s1516_s17 = sld [smem:[#allocation15_spill]] }
 0x400   : > { %p21_p8 = scmp.ge.s32.totalorder %s24_s23, 4   ;;  %s1517_s21 = sld [smem:[#allocation13_spill]] }
 0x401   : > { %s1518_s22 = sld [smem:[#allocation14_spill]]  ;;  %s1519_s18 = smov %s1141_s19 }
 0x402   : > { %s1520_s19 = smov %s1145_s20  ;;  %23 = sbr.rel (!%p21_p8) target bundleno = 10 (0xa), region = 108 }
 0x405   : > { %s1521_s20 = smov %s1516_s17 }
 0x409   :  { %693 = vsyncpa [#allocation3], 1 }
 0x40a   :  { %695 = vsyncpa [#allocation3 + $0x1], 1 }
 0x40b   :  { %696 = vsyncpa [#allocation6], 1 }
 0x40c   :  { %698 = vsyncpa [#allocation6 + $0x1], 1 }
 0x40d   :  { %699 = vsyncpa [#allocation4], 1 }
 0x40e   :  { %701 = vsyncpa [#allocation4 + $0x1], 1 }

</bundles_post_ra>
